<compile_context>
chip_gen: v5e
topology: v5e:2x2
jax: 0.10.0
libtpu: 0.0.40
codegen_flags: <defaults>
</compile_context>

<pallas_src>
import functools

import jax
import jax.numpy as jnp
from jax.experimental import pallas as pl
from jax.experimental.pallas import tpu as pltpu

_LANE = 512  # last-dim width (multiple of 128) -> wide, unmasked vector stores


def _sine_kernel(x_ref, o_ref, *, w0):
    # Elementwise sin(w0 * x); compute in f32, store in the output dtype.
    xf = x_ref[...].astype(jnp.float32)
    o_ref[...] = jnp.sin(jnp.float32(w0) * xf).astype(o_ref.dtype)


def _sine_pallas(x, w0, tile_rows):
    orig_shape = x.shape
    dtype = x.dtype
    n = x.size
    itemsize = jnp.dtype(dtype).itemsize

    # Minimum alignment: one full hardware tile of the (possibly packed) dtype.
    sub = max(8, 32 // itemsize)          # f32: 8, bf16: 16, int8/fp8: 32
    align = sub * _LANE

    x_flat = x.reshape(-1)
    n_pad = pl.cdiv(n, align) * align
    padded = n_pad != n
    if padded:
        x_flat = jnp.pad(x_flat, (0, n_pad - n))  # sin(0)=0, sliced off below
    rows = n_pad // _LANE
    x2d = x_flat.reshape(rows, _LANE)

    # Block rows: requested tile_rows rounded up to the sublane multiple,
    # clamped to the array extent. Grid handles a partial final block.
    tr = min(pl.cdiv(tile_rows, sub) * sub, rows)
    grid = (pl.cdiv(rows, tr),)

    cost = pl.CostEstimate(
        flops=2 * n,                       # scale + cast
        transcendentals=n,                 # sin
        bytes_accessed=2 * n * itemsize,   # read + write, streaming
    )

    out2d = pl.pallas_call(
        functools.partial(_sine_kernel, w0=w0),
        out_shape=jax.ShapeDtypeStruct((rows, _LANE), dtype),
        grid_spec=pltpu.PrefetchScalarGridSpec(
            num_scalar_prefetch=0,
            grid=grid,
            in_specs=[pl.BlockSpec((tr, _LANE), lambda i: (i, 0))],
            out_specs=pl.BlockSpec((tr, _LANE), lambda i: (i, 0)),
        ),
        compiler_params=pltpu.CompilerParams(
            dimension_semantics=("parallel",),   # shard across TCs on v7x
            vmem_limit_bytes=32 * 1024 * 1024,   # headroom for larger tiles (v5e)
        ),
        cost_estimate=cost,
    )(x2d)

    out_flat = out2d.reshape(-1)
    if padded:
        out_flat = out_flat[:n]
    return out_flat.reshape(orig_shape)


def sine(x, w0=30.0, activate=True, *, tile_rows=1024, min_pallas_elems=1 << 16):
    """Sine (SIREN) forward: sin(w0 * x) if activate else x.

    tile_rows=1024 with a 512-wide last dim => ~2 MiB f32 blocks (mem-bound
    sweet spot). Inputs smaller than `min_pallas_elems` elements use plain
    jnp.sin so XLA can fuse them (Pallas launch overhead is not worth it).
    """
    if not activate:
        return x  # pure passthrough, no copies
    n = x.size
    if n == 0:
        return x
    if n < min_pallas_elems:
        # Same math as the kernel (f32 compute) so both paths agree.
        return jnp.sin(jnp.float32(w0) * x.astype(jnp.float32)).astype(x.dtype)
    return _sine_pallas(x, float(w0), int(tile_rows))


if __name__ == "__main__":
    key = jax.random.PRNGKey(0)
    k0, k1, k2 = jax.random.split(key, 3)
    w0 = 30.0

    # Small NCHW input consistent with a conv-style SIREN pipeline.
    x = jax.random.normal(k0, (2, 4, 16, 16), dtype=jnp.float32)
    y_ref = jnp.sin(w0 * x)

    # 1) Force the Pallas path even at this small test size.
    y = jax.block_until_ready(sine(x, w0=w0, activate=True, min_pallas_elems=0))
    assert y.shape == x.shape and y.dtype == x.dtype
    assert jnp.allclose(y, y_ref, atol=1e-5, rtol=1e-5)

    # 2) Default dispatch (small input -> fused jnp fallback) must agree.
    y_small = jax.block_until_ready(sine(x, w0=w0, activate=True))
    assert jnp.allclose(y_small, y_ref, atol=1e-5, rtol=1e-5)

    # 3) Unaligned shape + small tile_rows -> exercises padding and the
    #    partial final block (rows=24, tr=16, grid=2).
    x_rag = jax.random.normal(k1, (2, 4, 35, 37), dtype=jnp.float32)
    y_rag = jax.block_until_ready(
        sine(x_rag, w0=w0, activate=True, tile_rows=16, min_pallas_elems=0))
    assert jnp.allclose(y_rag, jnp.sin(w0 * x_rag), atol=1e-5, rtol=1e-5)

    # 4) bf16 input: kernel upcasts to f32 internally, stores bf16.
    x_bf = jax.random.normal(k2, (2, 4, 16, 16), dtype=jnp.bfloat16)
    y_bf = jax.block_until_ready(sine(x_bf, w0=w0, activate=True, min_pallas_elems=0))
    y_bf_ref = jnp.sin(w0 * x_bf.astype(jnp.float32)).astype(jnp.bfloat16)
    assert y_bf.dtype == jnp.bfloat16
    assert jnp.allclose(y_bf.astype(jnp.float32), y_bf_ref.astype(jnp.float32),
                        atol=2e-2, rtol=2e-2)

    # 5) activate=False passthrough is a no-op.
    y_id = jax.block_until_ready(sine(x, w0=w0, activate=False))
    assert jnp.allclose(y_id, x)

    print("KERNEL_OK")
</pallas_src>

<mosaic_0001>
module attributes {stable_mosaic.version = 11 : i64} {
  func.func @_sine_kernel(%arg0: i32, %arg1: memref<8x512xf32, #tpu.memory_space<vmem>>, %arg2: memref<8x512xf32, #tpu.memory_space<vmem>>) attributes {dimension_semantics = [#tpu.dimension_semantics<parallel>], iteration_bounds = array<i64: 1>, scalar_prefetch = 0 : i64, scratch_operands = 0 : i64, tpu.core_type = #tpu.core_type<tc>, window_params = [{transform_indices = @transform_0, window_bounds = array<i64: 8, 512>}, {transform_indices = @transform_1, window_bounds = array<i64: 8, 512>}]} {
    %c0 = arith.constant 0 : index
    %c0_0 = arith.constant 0 : index
    %0 = vector.load %arg1[%c0, %c0_0] : memref<8x512xf32, #tpu.memory_space<vmem>>, vector<8x512xf32>
    %cst = arith.constant 3.000000e+01 : f32
    %1 = vector.broadcast %cst : f32 to vector<8x512xf32>
    %2 = arith.mulf %1, %0 : vector<8x512xf32>
    %3 = math.sin %2 : vector<8x512xf32>
    %c0_1 = arith.constant 0 : index
    %c0_2 = arith.constant 0 : index
    %4 = vector.load %arg2[%c0_1, %c0_2] : memref<8x512xf32, #tpu.memory_space<vmem>>, vector<8x512xf32>
    tpu.vector_store %arg2[%c0_1, %c0_2], %3 {strides = array<i32>} : memref<8x512xf32, #tpu.memory_space<vmem>>, vector<8x512xf32>,
    return
  }
  func.func @transform_0(%arg0: i32) -> (i32, i32) {
    %c0_i32 = arith.constant 0 : i32
    %c0_i32_0 = arith.constant 0 : i32
    return %arg0, %c0_i32 : i32, i32
  }
  func.func @transform_1(%arg0: i32) -> (i32, i32) {
    %c0_i32 = arith.constant 0 : i32
    %c0_i32_0 = arith.constant 0 : i32
    return %arg0, %c0_i32 : i32, i32
  }
}

</mosaic_0001>

<bundles_post_ra>
// kernel: tpu_custom_call.1
= control target key start
LH: loop header
LB: loop body
LE: loop exit
PB: predicated region body
PF: predicated region fallthrough
CT: control target
= control target key end

     0   :  { %6 = vsyncpa [#allocation3], 0  ;;  %s1181_s0 = inlined_call_operand.hbm [shape: f32[8,512], index: 0, kind: input, shape index: {}]   ;;  %s1182_s1 = inlined_call_operand.hbm [shape: f32[8,512], index: 1, kind: output, shape index: {}]  }
   0x1   :  { %7 = vsyncpa [#allocation4], 0  ;;  %s13_s8 = sshll.u32 %s1181_s0, 4  ;;  %s745_s9 = smov [#allocation2]   ;;  %s14_s8 = int_to_ptr.hbm [resolvable:$true] %s13_s8 }
   0x2   :  { %s15_s10 = sshll.u32 %s745_s9, 4  ;;  %s16_s10 = int_to_ptr.vmem [resolvable:$true] %s15_s10 }
   0x3   :  { %18 = dma.hbm_to_vmem [thread:$0]  %s14_s8, 512, %s16_s10, [#allocation3]  }
   0x4   :  { %741 = dma.done.wait [#allocation3], 512  }
   0x5   :  { %742 = vsyncadd [#allocation3], 4294966784  ;;  %v23_v0 = vld [vmem:[#allocation2] sm:$0xff]  ;;  %v24_v1 = vld [vmem:[#allocation2 + $0x8] sm:$0xff]  ;;  %v746_v31 = vmov 683565275  }
   0x6   :  { %v25_v2 = vld [vmem:[#allocation2 + $0x10] sm:$0xff]  ;;  %v767_v3 = vmul.f32 30.0, %v23_v0  ;;  %v769_v4 = vmul.f32 30.0, %v24_v1  ;;  %v747_v33 = vmov 2475754826   ;;  %s753_s0 = smov [#allocation5]  }
   0x7   :  { %v771_v5 = vmul.f32 30.0, %v25_v2  ;;  %v748_v35 = vmov 2131351028   ;;  %v749_v37 = vmov 2102212464   ;;  %s660_s11 = sshll.u32 %s753_s0, 4  ;;  %s661_s11 = int_to_ptr.vmem [resolvable:$true] %s660_s11 }
   0x8   :  { %v31_v6 = vand.u32 2147483647, %v767_v3  ;;  %v34_v7 = vand.u32 2139095040, %v767_v3  ;;  %v186_v8 = vand.u32 2147483647, %v769_v4  ;;  %v189_v9 = vand.u32 2139095040, %v769_v4 }
   0x9   :  { %v344_v10 = vand.u32 2139095040, %v771_v5  ;;  %v750_v39 = vmov 920167782   ;;  %v751_v48 = vmov 1326507024   ;;  %s662_s14 = sshll.u32 %s1182_s1, 4  ;;  %s663_s14 = int_to_ptr.hbm [resolvable:$true] %s662_s14 }
   0xa   :  { %v35_v11 = vshrl.u32 %v34_v7, 23  ;;  %v38_v12 = vand.u32 8388607, %v31_v6  ;;  %v190_v13 = vshrl.u32 %v189_v9, 23  ;;  %v193_v14 = vand.u32 8388607, %v186_v8 }
   0xb   :  { %v345_v18 = vshrl.u32 %v344_v10, 23 }
   0xc   :  { %v672_v15 = vadd.s32 4294967169, %v35_v11  ;;  %v39_v16 = vor.u32 8388608, %v38_v12  ;;  %v675_v17 = vadd.s32 4294967169, %v190_v13  ;;  %v194_v20 = vor.u32 8388608, %v193_v14 }
   0xd   :  { %v678_v24 = vadd.s32 4294967169, %v345_v18 }
   0xe   :  { %v41_v19 = vadd.s32 1, %v672_v15  ;;  %v196_v21 = vadd.s32 1, %v675_v17  ;;  %v782_v23 = vshll.u32 %v39_v16, 8  ;;  %v788_v29 = vshll.u32 %v194_v20, 8 }
   0xf   :  { %v796_v42 = vadd.s32 1, %v678_v24 }
  0x10   :  { %vm42_vm0 = vcmp.gt.s32.totalorder %v41_v19, 0  ;;  %vm197_vm1 = vcmp.gt.s32.totalorder %v196_v21, 0  ;;  %v80_v41 = vand.u32 65535, %v782_v23  ;;  %v81_v46 = vshrl.u32 %v782_v23, 16 }
  0x11   :  { %v43_v22 = vsel %vm42_vm0, %v41_v19, 0  ;;  %v198_v26 = vsel %vm197_vm1, %v196_v21, 0  ;;  %vm352_vm15 = vcmp.gt.s32.totalorder %v796_v42, 0 }
  0x12   :  { %v45_v25 = vand.u32 31, %v43_v22  ;;  %v784_v27 = vshrl.u32 %v43_v22, 5  ;;  %v786_v28 = vand.u32 31, %v198_v26  ;;  %v816_v59 = vshrl.u32 %v198_v26, 5 }
  0x14   :  { %v46_v30 = vsub.s32 32, %v45_v25  ;;  %v48_v32 = vshll.u32 %v746_v31, %v45_v25  ;;  %v51_v34 = vshll.u32 %v747_v33, %v45_v25  ;;  %v54_v36 = vshll.u32 %v748_v35, %v45_v25 }
  0x15   :  { %v57_v38 = vshll.u32 %v749_v37, %v45_v25  ;;  %v60_v40 = vshll.u32 %v750_v39, %v45_v25  ;;  %vm63_vm2 = vcmp.lt.s32.totalorder %v784_v27, 1  ;;  %vm66_vm3 = vcmp.lt.s32.totalorder %v784_v27, 4 }
  0x16   :  { %v49_v43 = vshrl.u32 %v747_v33, %v46_v30  ;;  %v52_v44 = vshrl.u32 %v748_v35, %v46_v30  ;;  %v55_v45 = vshrl.u32 %v749_v37, %v46_v30  ;;  %v58_v47 = vshrl.u32 %v750_v39, %v46_v30 }
  0x17   :  { %v61_v49 = vshrl.u32 %v751_v48, %v46_v30  ;;  %v807_v53 = vsub.s32 32, %v786_v28  ;;  %v47_v54 = vshrl.u32 %v746_v31, %v46_v30  ;;  %vm65_vm4 = vcmp.lt.s32.totalorder %v784_v27, 3 }
  0x18   :  { %v50_v50 = vor.u32 %v49_v43, %v48_v32  ;;  %v53_v51 = vor.u32 %v52_v44, %v51_v34  ;;  %v56_v52 = vor.u32 %v55_v45, %v54_v36  ;;  %v59_v55 = vor.u32 %v58_v47, %v57_v38 }
  0x19   :  { %v62_v56 = vor.u32 %v61_v49, %v60_v40  ;;  %vm64_vm5 = vcmp.lt.s32.totalorder %v784_v27, 2  ;;  %v203_v62 = vshll.u32 %v746_v31, %v786_v28  ;;  %v206_v63 = vshll.u32 %v747_v33, %v786_v28 }
  0x1a   :  { %v71_v57 = vsel %vm63_vm2, %v50_v50, %v53_v51  ;;  %v75_v58 = vsel %vm63_vm2, %v53_v51, %v56_v52  ;;  %v72_v60 = vsel %vm66_vm3, %v59_v55, 920167782  ;;  %v68_v0 = vsel %vm66_vm3, %v56_v52, 2102212464 }
  0x1b   :  { %v76_v61 = vsel %vm66_vm3, %v62_v56, 1326507024  ;;  %v73_v1 = vsel %vm65_vm4, %v56_v52, %v72_v60  ;;  %v204_v7 = vshrl.u32 %v747_v33, %v807_v53  ;;  %v67_v9 = vsel %vm63_vm2, %v47_v54, %v50_v50 }
  0x1c   :  { %v77_v2 = vsel %vm65_vm4, %v59_v55, %v76_v61  ;;  %v74_v10 = vsel %vm64_vm5, %v71_v57, %v73_v1  ;;  %v207_v12 = vshrl.u32 %v748_v35, %v807_v53  ;;  %v69_v17 = vsel %vm65_vm4, %v53_v51, %v68_v0 }
  0x1d   :  { %v78_v11 = vsel %vm64_vm5, %v75_v58, %v77_v2  ;;  %v104_v15 = vand.u32 65535, %v74_v10  ;;  %v105_v16 = vshrl.u32 %v74_v10, 16  ;;  %v844_v18 = vor.u32 %v204_v7, %v203_v62 }
  0x1e   :  { %v82_v13 = vand.u32 65535, %v78_v11  ;;  %v83_v14 = vshrl.u32 %v78_v11, 16  ;;  %v846_v19 = vor.u32 %v207_v12, %v206_v63  ;;  %v209_v20 = vshll.u32 %v748_v35, %v786_v28 }
  0x1f   :  { %v210_v25 = vshrl.u32 %v749_v37, %v807_v53  ;;  %v106_v30 = vmul.u32 %v104_v15, %v80_v41  ;;  %v107_v32 = vmul.u32 %v105_v16, %v80_v41  ;;  %v108_v34 = vmul.u32 %v104_v15, %v81_v46 }
  0x20   :  { %v84_v21 = vmul.u32 %v82_v13, %v80_v41  ;;  %v85_v22 = vmul.u32 %v83_v14, %v80_v41  ;;  %v86_v24 = vmul.u32 %v82_v13, %v81_v46  ;;  %v87_v26 = vmul.u32 %v83_v14, %v81_v46 }
  0x21   :  { %v109_v43 = vmul.u32 %v105_v16, %v81_v46  ;;  %v110_v45 = vshll.u32 %v107_v32, 16  ;;  %v111_v47 = vshrl.u32 %v107_v32, 16  ;;  %v112_v49 = vshll.u32 %v108_v34, 16 }
  0x22   :  { %v88_v36 = vshll.u32 %v85_v22, 16  ;;  %v89_v38 = vshrl.u32 %v85_v22, 16  ;;  %v90_v40 = vshll.u32 %v86_v24, 16  ;;  %v91_v44 = vshrl.u32 %v86_v24, 16 }
  0x23   :  { %v113_v51 = vshrl.u32 %v108_v34, 16  ;;  %v212_v52 = vshll.u32 %v749_v37, %v786_v28  ;;  %v752_v54 = vmov 0   ;;  %vm114_vm7 = vc.u32 %v106_v30, %v110_v45 }
  0x24   :  { %vm92_vm6 = vc.u32 %v84_v21, %v88_v36  ;;  %v94_v50 = vadd.s32 %v88_v36, %v84_v21  ;;  %v116_v41 = vadd.s32 %v110_v45, %v106_v30  ;;  %v213_v56 = vshrl.u32 %v750_v39, %v807_v53 }
  0x25   :  { %v93_v55 = vsel %vm92_vm6, 1, %v752_v54  ;;  %v115_v46 = vsel %vm114_vm7, 1, %v752_v54  ;;  %v215_v58 = vshll.u32 %v750_v39, %v786_v28  ;;  %v211_v62 = vor.u32 %v210_v25, %v209_v20 }
  0x26   :  { %v95_v57 = vadd.s32 %v93_v55, %v87_v26  ;;  %vm96_vm8 = vc.u32 %v94_v50, %v90_v40  ;;  %v117_v61 = vadd.s32 %v115_v46, %v109_v43  ;;  %vm118_vm9 = vc.u32 %v116_v41, %v112_v49 }
  0x27   :  { %v97_v60 = vsel %vm96_vm8, 1, %v752_v54  ;;  %v119_v0 = vsel %vm118_vm9, 1, %v752_v54  ;;  %v214_v1 = vor.u32 %v213_v56, %v212_v52  ;;  %v216_v2 = vshrl.u32 %v751_v48, %v807_v53 }
  0x28   :  { %v99_v63 = vadd.s32 %v97_v60, %v95_v57  ;;  %v864_v7 = vadd.s32 %v116_v41, %v112_v49  ;;  %v121_v10 = vadd.s32 %v119_v0, %v117_v61  ;;  %vm218_vm10 = vcmp.lt.s32.totalorder %v816_v59, 1 }
  0x29   :  { %vm220_vm11 = vcmp.lt.s32.totalorder %v816_v59, 3  ;;  %v217_v11 = vor.u32 %v216_v2, %v215_v58  ;;  %vm219_vm12 = vcmp.lt.s32.totalorder %v816_v59, 2  ;;  %vm221_vm13 = vcmp.lt.s32.totalorder %v816_v59, 4 }
  0x2a   :  { %v100_v28 = vadd.s32 %v99_v63, %v89_v38  ;;  %v70_v12 = vsel %vm64_vm5, %v67_v9, %v69_v17  ;;  %v122_v13 = vadd.s32 %v121_v10, %v111_v47  ;;  %v226_v14 = vsel %vm218_vm10, %v844_v18, %v846_v19 }
  0x2b   :  { %v227_v15 = vsel %vm221_vm13, %v214_v1, 920167782  ;;  %v230_v21 = vsel %vm218_vm10, %v846_v19, %v211_v62  ;;  %v235_v27 = vand.u32 65535, %v788_v29  ;;  %v231_v22 = vsel %vm221_vm13, %v217_v11, 1326507024 }
  0x2c   :  { %v878_v16 = vadd.s32 %v100_v28, %v91_v44  ;;  %v228_v20 = vsel %vm220_vm11, %v211_v62, %v227_v15  ;;  %v123_v9 = vadd.s32 %v122_v13, %v113_v51  ;;  %v236_v24 = vshrl.u32 %v788_v29, 16 }
  0x2d   :  { %v229_v17 = vsel %vm219_vm12, %v226_v14, %v228_v20  ;;  %v124_v25 = vmul.u32 %v782_v23, %v70_v12  ;;  %v232_v26 = vsel %vm220_vm11, %v214_v1, %v231_v22  ;;  %v202_v38 = vshrl.u32 %v746_v31, %v807_v53 }
  0x2e   :  { %vm126_vm14 = vc.u32 %v878_v16, %v864_v7  ;;  %v259_v30 = vand.u32 65535, %v229_v17  ;;  %v127_v32 = vadd.s32 1, %v123_v9  ;;  %v233_v34 = vsel %vm219_vm12, %v230_v21, %v232_v26 }
  0x2f   :  { %v260_v36 = vshrl.u32 %v229_v17, 16  ;;  %v237_v40 = vand.u32 65535, %v233_v34  ;;  %v238_v43 = vshrl.u32 %v233_v34, 16  ;;  %v223_v44 = vsel %vm221_vm13, %v211_v62, 2102212464 }
  0x30   :  { %v128_v23 = vsel %vm126_vm14, %v127_v32, %v123_v9  ;;  %v263_v47 = vmul.u32 %v259_v30, %v236_v24  ;;  %v261_v52 = vmul.u32 %v259_v30, %v235_v27  ;;  %v353_v56 = vsel %vm352_vm15, %v796_v42, 0 }
  0x31   :  { %v262_v45 = vmul.u32 %v260_v36, %v235_v27  ;;  %v129_v49 = vadd.s32 %v128_v23, %v124_v25  ;;  %v239_v50 = vmul.u32 %v237_v40, %v235_v27  ;;  %v240_v51 = vmul.u32 %v238_v43, %v235_v27 }
  0x32   :  { %v241_v55 = vmul.u32 %v237_v40, %v236_v24  ;;  %v222_v53 = vsel %vm218_vm10, %v202_v38, %v844_v18  ;;  %v242_v46 = vmul.u32 %v238_v43, %v236_v24  ;;  %v224_v60 = vsel %vm220_vm11, %v846_v19, %v223_v44 }
  0x33   :  { %v265_v41 = vshll.u32 %v262_v45, 16  ;;  %v130_v57 = vadd.s32 536870912, %v129_v49  ;;  %v243_v58 = vshll.u32 %v240_v51, 16  ;;  %v264_v62 = vmul.u32 %v260_v36, %v236_v24 }
  0x34   :  { %v245_v61 = vshll.u32 %v241_v55, 16  ;;  %v267_v63 = vshll.u32 %v263_v47, 16  ;;  %v244_v42 = vshrl.u32 %v240_v51, 16  ;;  %v266_v12 = vshrl.u32 %v262_v45, 16 }
  0x35   :  { %v910_v0 = vshrl.u32 %v130_v57, 30  ;;  %vm247_vm0 = vc.u32 %v239_v50, %v243_v58  ;;  %v249_v1 = vadd.s32 %v243_v58, %v239_v50  ;;  %vm269_vm1 = vc.u32 %v261_v52, %v265_v41 }
  0x36   :  { %v248_v2 = vsel %vm247_vm0, 1, %v752_v54  ;;  %v270_v10 = vsel %vm269_vm1, 1, %v752_v54  ;;  %v271_v18 = vadd.s32 %v265_v41, %v261_v52  ;;  %v355_v14 = vand.u32 31, %v353_v56 }
  0x37   :  { %v132_v28 = vshll.u32 %v910_v0, 30  ;;  %v250_v11 = vadd.s32 %v248_v2, %v242_v46  ;;  %vm251_vm2 = vc.u32 %v249_v1, %v245_v61  ;;  %v272_v13 = vadd.s32 %v270_v10, %v264_v62 }
  0x38   :  { %v252_v19 = vsel %vm251_vm2, 1, %v752_v54  ;;  %vm273_vm3 = vc.u32 %v271_v18, %v267_v63  ;;  %v246_v20 = vshrl.u32 %v241_v55, 16  ;;  %v268_v9 = vshrl.u32 %v263_v47, 16 }
  0x39   :  { %v133_v15 = vsub.s32 %v129_v49, %v132_v28  ;;  %v254_v21 = vadd.s32 %v252_v19, %v250_v11  ;;  %v274_v27 = vsel %vm273_vm3, 1, %v752_v54  ;;  %v341_v22 = vand.u32 2147483647, %v771_v5 }
  0x3a   :  { %v276_v17 = vadd.s32 %v274_v27, %v272_v13  ;;  %v918_v26 = vadd.s32 %v271_v18, %v267_v63  ;;  %v225_v30 = vsel %vm219_vm12, %v222_v53, %v224_v60  ;;  %v356_v34 = vsub.s32 32, %v355_v14 }
  0x3b   :  { %vm134_vm4 = vcmp.lt.s32.totalorder %v133_v15, 0  ;;  %v135_v24 = vsub.s32 0, %v133_v15  ;;  %v255_v25 = vadd.s32 %v254_v21, %v244_v42  ;;  %vm33_vm5 = vcmp.lt.s32.totalorder %v767_v3, 0 }
  0x3c   :  { %v277_v32 = vadd.s32 %v276_v17, %v266_v12  ;;  %v125_v40 = vadd.s32 %v864_v7, %v878_v16  ;;  %v348_v44 = vand.u32 8388607, %v341_v22  ;;  %v155_v45 = vsub.s32 4, %v910_v0 }
  0x3d   :  { %v136_v36 = vsel %vm134_vm4, %v135_v24, %v133_v15  ;;  %v923_v38 = vadd.s32 %v255_v25, %v246_v20  ;;  %v279_v59 = vmul.u32 %v788_v29, %v225_v30  ;;  %v933_v47 = vshrl.u32 %v353_v56, 5 }
  0x3e   :  { %v137_v43 = vclz %v136_v36  ;;  %v278_v23 = vadd.s32 %v277_v32, %v268_v9  ;;  %vm937_vm7 = vcmp.le.f32.partialorder %v31_v6, 0.7853982  ;;  %v367_v50 = vshll.u32 %v749_v37, %v355_v14 }
  0x3f   :  { %vm281_vm6 = vc.u32 %v923_v38, %v918_v26  ;;  %v368_v51 = vshrl.u32 %v750_v39, %v356_v34  ;;  %v358_v52 = vshll.u32 %v746_v31, %v355_v14  ;;  %v359_v29 = vshrl.u32 %v747_v33, %v356_v34 }
  0x40   :  { %v673_v7 = vadd.s32 4294967294, %v137_v43  ;;  %v282_v16 = vadd.s32 1, %v278_v23  ;;  %v361_v55 = vshll.u32 %v747_v33, %v355_v14  ;;  %v362_v41 = vshrl.u32 %v748_v35, %v356_v34  ;;  %v26_v43 = vld [vmem:[#allocation2 + $0x18] sm:$0xff] }
  0x41   :  { %v364_v6 = vshll.u32 %v748_v35, %v355_v14  ;;  %v365_v57 = vshrl.u32 %v749_v37, %v356_v34  ;;  %v370_v58 = vshll.u32 %v750_v39, %v355_v14  ;;  %v371_v60 = vshrl.u32 %v751_v48, %v356_v34 }
  0x42   :  { %vm674_vm8 = vcmp.lt.s32.totalorder %v673_v7, 0  ;;  %v283_v56 = vsel %vm281_vm6, %v282_v16, %v278_v23  ;;  %v369_v1 = vor.u32 %v368_v51, %v367_v50  ;;  %v156_v42 = vsel %vm33_vm5, %v155_v45, %v910_v0 }
  0x43   :  { %v140_v53 = vsel %vm674_vm8, 0, %v673_v7  ;;  %v284_v46 = vadd.s32 %v283_v56, %v279_v59  ;;  %v360_v10 = vor.u32 %v359_v29, %v358_v52  ;;  %v954_v18 = vor.u32 %v362_v41, %v361_v55 }
  0x44   :  { %v141_v61 = vsub.s32 32, %v140_v53  ;;  %v142_v62 = vshll.u32 %v133_v15, %v140_v53  ;;  %v145_v63 = vsub.s32 4294967266, %v140_v53  ;;  %v366_v12 = vor.u32 %v365_v57, %v364_v6 }
  0x45   :  { %v285_v2 = vadd.s32 536870912, %v284_v46  ;;  %vm373_vm9 = vcmp.lt.s32.totalorder %v933_v47, 1  ;;  %v372_v13 = vor.u32 %v371_v60, %v370_v58  ;;  %vm375_vm10 = vcmp.lt.s32.totalorder %v933_v47, 3 }
  0x46   :  { %v143_v28 = vshrl.u32 %v125_v40, %v141_v61  ;;  %v146_v11 = vadd.s32 127, %v145_v63  ;;  %vm376_vm11 = vcmp.lt.s32.totalorder %v933_v47, 4  ;;  %v349_v20 = vor.u32 8388608, %v348_v44 }
  0x47   :  { %v957_v19 = vshrl.u32 %v285_v2, 30  ;;  %v382_v0 = vsel %vm376_vm11, %v369_v1, 920167782  ;;  %v158_v21 = vsel %vm937_vm7, 0, %v156_v42  ;;  %vm374_vm12 = vcmp.lt.s32.totalorder %v933_v47, 2 }
  0x48   :  { %v144_v14 = vor.u32 %v143_v28, %v142_v62  ;;  %v147_v15 = vshll.u32 %v146_v11, 23  ;;  %v381_v24 = vsel %vm373_vm9, %v360_v10, %v954_v18  ;;  %v383_v25 = vsel %vm375_vm10, %v366_v12, %v382_v0 }
  0x49   :  { %v287_v27 = vshll.u32 %v957_v19, 30  ;;  %v357_v32 = vshrl.u32 %v746_v31, %v356_v34  ;;  %v385_v36 = vsel %vm373_vm9, %v954_v18, %v366_v12  ;;  %v386_v40 = vsel %vm376_vm11, %v372_v13, 1326507024 }
  0x4a   :  { %v148_v9 = vor.u32 4788187, %v147_v15  ;;  %v151_v17 = vcvt.s32.f32 %v144_v14  ;;  %v175_v44 = vadd.s32 3, %v158_v21  ;;  %v387_v45 = vsel %vm375_vm10, %v369_v1, %v386_v40 }
  0x4b   :  { %v972_v30 = vsub.s32 %v284_v46, %v287_v27  ;;  %v982_v59 = vshll.u32 %v349_v20, 8  ;;  %v384_v34 = vsel %vm374_vm12, %v381_v24, %v383_v25  ;;  %v388_v16 = vsel %vm374_vm12, %v385_v36, %v387_v45 }
  0x4c   :  { %v149_v23 = vand.u32 2147483647, %v148_v9  ;;  %v392_v29 = vand.u32 65535, %v388_v16  ;;  %v992_v55 = vmul.f32 30.0, %v26_v43  ;;  %v393_v56 = vshrl.u32 %v388_v16, 16 }
  0x4d   :  { %vm289_vm13 = vcmp.lt.s32.totalorder %v972_v30, 0  ;;  %v290_v7 = vsub.s32 0, %v972_v30  ;;  %v390_v51 = vand.u32 65535, %v982_v59  ;;  %v391_v52 = vshrl.u32 %v982_v59, 16 }
  0x4e   :  { %v152_v50 = vmul.f32 %v151_v17, %v149_v23  ;;  %v280_v57 = vadd.s32 %v918_v26, %v923_v38  ;;  %v999_v58 = vand.u32 3, %v175_v44  ;;  %v415_v62 = vshrl.u32 %v384_v34, 16 }
  0x4f   :  { %v291_v41 = vsel %vm289_vm13, %v290_v7, %v972_v30  ;;  %v997_v46 = vmul.u32 %v392_v29, %v391_v52  ;;  %v394_v60 = vmul.u32 %v392_v29, %v390_v51  ;;  %v395_v61 = vmul.u32 %v393_v56, %v390_v51 }
  0x50   :  { %v153_v6 = vxor.u32 2147483648, %v152_v50  ;;  %v292_v53 = vclz %v291_v41  ;;  %v377_v42 = vsel %vm373_vm9, %v357_v32, %v360_v10  ;;  %v378_v2 = vsel %vm376_vm11, %v366_v12, 2102212464 }
  0x51   :  { %v398_v38 = vshll.u32 %v395_v61, 16  ;;  %v400_v28 = vshll.u32 %v997_v46, 16  ;;  %v414_v11 = vand.u32 65535, %v384_v34  ;;  %vm188_vm14 = vcmp.lt.s32.totalorder %v769_v4, 0 }
  0x52   :  { %v154_v63 = vsel %vm33_vm5, %v153_v6, %v152_v50  ;;  %v676_v1 = vadd.s32 4294967294, %v292_v53  ;;  %v310_v10 = vsub.s32 4, %v957_v19  ;;  %v397_v14 = vmul.u32 %v393_v56, %v391_v52 }
  0x53   :  { %v1010_v26 = vsel %vm937_vm7, %v767_v3, %v154_v63  ;;  %vm402_vm0 = vc.u32 %v394_v60, %v398_v38  ;;  %v404_v12 = vadd.s32 %v398_v38, %v394_v60  ;;  %v1017_v20 = vmul.u32 %v415_v62, %v390_v51 }
  0x54   :  { %v159_v13 = vmul.f32 %v1010_v26, %v1010_v26  ;;  %vm677_vm15 = vcmp.lt.s32.totalorder %v676_v1, 0  ;;  %v403_v17 = vsel %vm402_vm0, 1, %v752_v54  ;;  %v1021_v24 = vmul.u32 %v414_v11, %v391_v52 }
  0x55   :  { %v295_v15 = vsel %vm677_vm15, 0, %v676_v1  ;;  %vm406_vm1 = vc.u32 %v404_v12, %v400_v28  ;;  %vm1025_vm2 = vcmp.le.f32.partialorder %v186_v8, 0.7853982  ;;  %v405_v43 = vadd.s32 %v403_v17, %v397_v14 }
  0x56   :  { %v160_v49 = vmul.f32 -0.001358992, %v159_v13  ;;  %v167_v0 = vmul.f32 -0.00019511016, %v159_v13  ;;  %v296_v21 = vsub.s32 32, %v295_v15  ;;  %v297_v27 = vshll.u32 %v972_v30, %v295_v15 }
  0x57   :  { %v300_v9 = vsub.s32 4294967266, %v295_v15  ;;  %vm181_vm3 = vcmp.eq.s32.totalorder %v999_v58, 2  ;;  %v379_v30 = vsel %vm375_vm10, %v954_v18, %v378_v2  ;;  %v399_v44 = vshrl.u32 %v395_v61, 16 }
  0x58   :  { %v161_v25 = vadd.f32 0.041655596, %v160_v49  ;;  %v168_v32 = vadd.f32 0.008332121, %v167_v0  ;;  %v298_v40 = vshrl.u32 %v280_v57, %v296_v21  ;;  %v416_v45 = vmul.u32 %v414_v11, %v390_v51 }
  0x59   :  { %v301_v23 = vadd.s32 127, %v300_v9  ;;  %v407_v50 = vsel %vm406_vm1, 1, %v752_v54  ;;  %vm178_vm4 = vcmp.eq.s32.totalorder %v999_v58, 0  ;;  %v419_v41 = vmul.u32 %v415_v62, %v391_v52 }
  0x5a   :  { %v162_v7 = vmul.f32 %v161_v25, %v159_v13  ;;  %v169_v34 = vmul.f32 %v168_v32, %v159_v13  ;;  %v299_v16 = vor.u32 %v298_v40, %v297_v27  ;;  %v409_v29 = vadd.s32 %v407_v50, %v405_v43 }
  0x5b   :  { %v302_v8 = vshll.u32 %v301_v23, 23  ;;  %v420_v56 = vshll.u32 %v1017_v20, 16  ;;  %v380_v53 = vsel %vm374_vm12, %v377_v42, %v379_v30  ;;  %v422_v18 = vshll.u32 %v1021_v24, 16 }
  0x5c   :  { %v163_v6 = vadd.f32 -0.4999988, %v162_v7  ;;  %v170_v57 = vadd.f32 -0.16666654, %v169_v34  ;;  %v306_v60 = vcvt.s32.f32 %v299_v16  ;;  %v311_v61 = vsel %vm188_vm14, %v310_v10, %v957_v19 }
  0x5d   :  { %v303_v51 = vor.u32 4788187, %v302_v8  ;;  %vm424_vm5 = vc.u32 %v416_v45, %v420_v56  ;;  %v426_v62 = vadd.s32 %v420_v56, %v416_v45  ;;  %v401_v38 = vshrl.u32 %v997_v46, 16 }
  0x5e   :  { %v164_v63 = vmul.f32 %v163_v6, %v159_v13  ;;  %v171_v1 = vmul.f32 %v170_v57, %v159_v13  ;;  %v425_v52 = vsel %vm424_vm5, 1, %v752_v54  ;;  %v410_v28 = vadd.s32 %v409_v29, %v399_v44 }
  0x5f   :  { %v304_v2 = vand.u32 2147483647, %v303_v51  ;;  %v427_v47 = vadd.s32 %v425_v52, %v419_v41  ;;  %v421_v14 = vshrl.u32 %v1017_v20, 16  ;;  %vm428_vm6 = vc.u32 %v426_v62, %v422_v18 }
  0x60   :  { %v165_v42 = vadd.f32 1.0, %v164_v63  ;;  %v172_v11 = vadd.f32 1.0, %v171_v1  ;;  %v313_v19 = vsel %vm1025_vm2, 0, %v311_v61  ;;  %v429_v10 = vsel %vm428_vm6, 1, %v752_v54 }
  0x61   :  { %v307_v15 = vmul.f32 %v306_v60, %v304_v2  ;;  %v499_v13 = vand.u32 2139095040, %v992_v55  ;;  %v423_v46 = vshrl.u32 %v1021_v24, 16  ;;  %v431_v0 = vadd.s32 %v429_v10, %v427_v47 }
  0x62   :  { %v173_v12 = vmul.f32 %v172_v11, %v1010_v26  ;;  %v182_v49 = vxor.u32 2147483648, %v165_v42  ;;  %v1051_v27 = vadd.s32 %v410_v28, %v401_v38  ;;  %v1053_v9 = vadd.s32 %v426_v62, %v422_v18 }
  0x63   :  { %v308_v21 = vxor.u32 2147483648, %v307_v15  ;;  %v500_v20 = vshrl.u32 %v499_v13, 23  ;;  %vm177_vm7 = vcmp.lt.s32.totalorder %v999_v58, 2  ;;  %v432_v32 = vadd.s32 %v431_v0, %v421_v14 }
  0x64   :  { %v179_v17 = vxor.u32 2147483648, %v173_v12  ;;  %v183_v25 = vsel %vm181_vm3, %v182_v49, %v173_v12  ;;  %vm174_vm8 = vweird.f32 %v767_v3  ;;  %v434_v24 = vmul.u32 %v982_v59, %v380_v53 }
  0x65   :  { %v309_v26 = vsel %vm188_vm14, %v308_v21, %v307_v15  ;;  %v681_v40 = vadd.s32 4294967169, %v500_v20  ;;  %v330_v30 = vadd.s32 3, %v313_v19  ;;  %v433_v44 = vadd.s32 %v432_v32, %v423_v46 }
  0x66   :  { %v180_v43 = vsel %vm178_vm4, %v165_v42, %v179_v17  ;;  %v312_v23 = vsel %vm1025_vm2, %v769_v4, %v309_v26  ;;  %vm436_vm9 = vc.u32 %v1051_v27, %v1053_v9  ;;  %v496_v59 = vand.u32 2147483647, %v992_v55 }
  0x67   :  { %v184_v45 = vsel %vm177_vm7, %v180_v43, %v183_v25  ;;  %v314_v7 = vmul.f32 %v312_v23, %v312_v23  ;;  %v506_v3 = vadd.s32 1, %v681_v40  ;;  %v437_v16 = vadd.s32 1, %v433_v44 }
  0x68   :  { %v185_v34 = vsel %vm174_vm8, nan, %v184_v45  ;;  %v331_v56 = vand.u32 3, %v330_v30  ;;  %v503_v60 = vand.u32 8388607, %v496_v59  ;;  %vm329_vm12 = vweird.f32 %v769_v4 }
  0x69   :  { %v315_v50 = vmul.f32 -0.001358992, %v314_v7  ;;  %v322_v8 = vmul.f32 -0.00019511016, %v314_v7  ;;  %vm507_vm10 = vcmp.gt.s32.totalorder %v506_v3, 0  ;;  %651 = vst [vmem:[#allocation5] sm:$0xff] %v185_v34  ;;  %v438_v58 = vsel %vm436_vm9, %v437_v16, %v433_v44 }
  0x6a   :  { %v508_v29 = vsel %vm507_vm10, %v506_v3, 0  ;;  %v439_v6 = vadd.s32 %v438_v58, %v434_v24  ;;  %vm332_vm11 = vcmp.lt.s32.totalorder %v331_v56, 2  ;;  %vm336_vm13 = vcmp.eq.s32.totalorder %v331_v56, 2 }
  0x6b   :  { %v316_v36 = vadd.f32 0.041655596, %v315_v50  ;;  %v323_v41 = vadd.f32 0.008332121, %v322_v8  ;;  %v510_v57 = vand.u32 31, %v508_v29  ;;  %v1072_v61 = vshrl.u32 %v508_v29, 5 }
  0x6c   :  { %v440_v51 = vadd.s32 536870912, %v439_v6  ;;  %v504_v13 = vor.u32 8388608, %v503_v60  ;;  %vm333_vm0 = vcmp.eq.s32.totalorder %v331_v56, 0  ;;  %v435_v50 = vadd.s32 %v1053_v9, %v1051_v27 }
  0x6d   :  { %v317_v53 = vmul.f32 %v316_v36, %v314_v7  ;;  %v324_v18 = vmul.f32 %v323_v41, %v314_v7  ;;  %v1074_v63 = vsub.s32 32, %v510_v57  ;;  %v513_v1 = vshll.u32 %v746_v31, %v510_v57 }
  0x6e   :  { %v516_v52 = vshll.u32 %v747_v33, %v510_v57  ;;  %v1078_v38 = vshrl.u32 %v440_v51, 30  ;;  %v519_v28 = vshll.u32 %v748_v35, %v510_v57  ;;  %v522_v14 = vshll.u32 %v749_v37, %v510_v57 }
  0x6f   :  { %v318_v62 = vadd.f32 -0.4999988, %v317_v53  ;;  %v325_v2 = vadd.f32 -0.16666654, %v324_v18  ;;  %v514_v47 = vshrl.u32 %v747_v33, %v1074_v63  ;;  %v517_v42 = vshrl.u32 %v748_v35, %v1074_v63 }
  0x70   :  { %v520_v11 = vshrl.u32 %v749_v37, %v1074_v63  ;;  %v442_v10 = vshll.u32 %v1078_v38, 30  ;;  %v523_v49 = vshrl.u32 %v750_v39, %v1074_v63  ;;  %vm528_vm14 = vcmp.lt.s32.totalorder %v1072_v61, 1 }
  0x71   :  { %v319_v15 = vmul.f32 %v318_v62, %v314_v7  ;;  %v326_v19 = vmul.f32 %v325_v2, %v314_v7  ;;  %v1090_v12 = vor.u32 %v514_v47, %v513_v1  ;;  %v1095_v0 = vor.u32 %v517_v42, %v516_v52 }
  0x72   :  { %v443_v46 = vsub.s32 %v439_v6, %v442_v10  ;;  %v1097_v21 = vor.u32 %v520_v11, %v519_v28  ;;  %v524_v37 = vor.u32 %v523_v49, %v522_v14  ;;  %v525_v20 = vshll.u32 %v750_v39, %v510_v57 }
  0x73   :  { %v320_v33 = vadd.f32 1.0, %v319_v15  ;;  %v327_v35 = vadd.f32 1.0, %v326_v19  ;;  %v526_v17 = vshrl.u32 %v751_v48, %v1074_v63  ;;  %vm530_vm1 = vcmp.lt.s32.totalorder %v1072_v61, 3 }
  0x74   :  { %vm444_vm15 = vcmp.lt.s32.totalorder %v443_v46, 0  ;;  %v445_v26 = vsub.s32 0, %v443_v46  ;;  %vm531_vm2 = vcmp.lt.s32.totalorder %v1072_v61, 4  ;;  %v1104_v24 = vshll.u32 %v504_v13, 8 }
  0x75   :  { %v328_v25 = vmul.f32 %v327_v35, %v312_v23  ;;  %v337_v32 = vxor.u32 2147483648, %v320_v33  ;;  %v527_v44 = vor.u32 %v526_v17, %v525_v20  ;;  %vm529_vm3 = vcmp.lt.s32.totalorder %v1072_v61, 2 }
  0x76   :  { %v446_v30 = vsel %vm444_vm15, %v445_v26, %v443_v46  ;;  %v536_v48 = vsel %vm528_vm14, %v1090_v12, %v1095_v0  ;;  %v537_v23 = vsel %vm531_vm2, %v524_v37, 920167782  ;;  %v540_v58 = vsel %vm528_vm14, %v1095_v0, %v1097_v21 }
  0x77   :  { %v334_v40 = vxor.u32 2147483648, %v328_v25  ;;  %v338_v43 = vsel %vm336_vm13, %v337_v32, %v328_v25  ;;  %v447_v39 = vclz %v446_v30  ;;  %v538_v7 = vsel %vm530_vm1, %v1097_v21, %v537_v23 }
  0x78   :  { %v539_v8 = vsel %vm529_vm3, %v536_v48, %v538_v7  ;;  %v541_v29 = vsel %vm531_vm2, %v527_v44, 1326507024  ;;  %v545_v36 = vand.u32 65535, %v1104_v24  ;;  %v546_v4 = vshrl.u32 %v1104_v24, 16 }
  0x79   :  { %v335_v45 = vsel %vm333_vm0, %v320_v33, %v334_v40  ;;  %v679_v34 = vadd.s32 4294967294, %v447_v39  ;;  %v542_v27 = vsel %vm530_vm1, %v524_v37, %v541_v29  ;;  %v569_v9 = vand.u32 65535, %v539_v8 }
  0x7a   :  { %v339_v3 = vsel %vm332_vm11, %v335_v45, %v338_v43  ;;  %v570_v56 = vshrl.u32 %v539_v8, 16  ;;  %v543_v18 = vsel %vm529_vm3, %v540_v58, %v542_v27  ;;  %vm343_vm5 = vcmp.lt.s32.totalorder %v771_v5, 0 }
  0x7b   :  { %v340_v16 = vsel %vm329_vm12, nan, %v339_v3  ;;  %vm680_vm4 = vcmp.lt.s32.totalorder %v679_v34, 0  ;;  %v547_v51 = vand.u32 65535, %v543_v18  ;;  %v548_v52 = vshrl.u32 %v543_v18, 16 }
  0x7c   :  { %652 = vst [vmem:[#allocation5 + $0x8] sm:$0xff] %v340_v16  ;;  %v450_v41 = vsel %vm680_vm4, 0, %v679_v34  ;;  %v571_v2 = vmul.u32 %v569_v9, %v545_v36  ;;  %v572_v28 = vmul.u32 %v570_v56, %v545_v36  ;;  %v573_v47 = vmul.u32 %v569_v9, %v546_v4 }
  0x7d   :  { %v451_v6 = vsub.s32 32, %v450_v41  ;;  %v452_v57 = vshll.u32 %v443_v46, %v450_v41  ;;  %v455_v53 = vsub.s32 4294967266, %v450_v41  ;;  %v551_v62 = vmul.u32 %v547_v51, %v546_v4 }
  0x7e   :  { %vm1139_vm6 = vcmp.le.f32.partialorder %v341_v22, 0.7853982  ;;  %v549_v15 = vmul.u32 %v547_v51, %v545_v36  ;;  %v550_v19 = vmul.u32 %v548_v52, %v545_v36  ;;  %v512_v10 = vshrl.u32 %v746_v31, %v1074_v63 }
  0x7f   :  { %v453_v60 = vshrl.u32 %v435_v50, %v451_v6  ;;  %v456_v1 = vadd.s32 127, %v455_v53  ;;  %v552_v13 = vmul.u32 %v548_v52, %v546_v4  ;;  %v574_v49 = vmul.u32 %v570_v56, %v546_v4 }
  0x80   :  { %v575_v33 = vshll.u32 %v572_v28, 16  ;;  %v553_v37 = vshll.u32 %v550_v19, 16  ;;  %v555_v20 = vshll.u32 %v551_v62, 16  ;;  %v465_v17 = vsub.s32 4, %v1078_v38 }
  0x81   :  { %v454_v11 = vor.u32 %v453_v60, %v452_v57  ;;  %v457_v14 = vshll.u32 %v456_v1, 23  ;;  %v533_v22 = vsel %vm531_vm2, %v1097_v21, 2102212464  ;;  %v577_v25 = vshll.u32 %v573_v47, 16 }
  0x82   :  { %vm579_vm7 = vc.u32 %v571_v2, %v575_v33  ;;  %vm557_vm8 = vc.u32 %v549_v15, %v553_v37  ;;  %v559_v26 = vadd.s32 %v553_v37, %v549_v15  ;;  %v532_v63 = vsel %vm528_vm14, %v512_v10, %v1090_v12 }
  0x83   :  { %v458_v35 = vor.u32 4788187, %v457_v14  ;;  %v461_v46 = vcvt.s32.f32 %v454_v11  ;;  %v580_v31 = vsel %vm579_vm7, 1, %v752_v54  ;;  %v558_v40 = vsel %vm557_vm8, 1, %v752_v54 }
  0x84   :  { %v581_v43 = vadd.s32 %v575_v33, %v571_v2  ;;  %v582_v30 = vadd.s32 %v580_v31, %v574_v49  ;;  %v554_v39 = vshrl.u32 %v550_v19, 16  ;;  %v560_v48 = vadd.s32 %v558_v40, %v552_v13 }
  0x85   :  { %v459_v32 = vand.u32 2147483647, %v458_v35  ;;  %vm561_vm9 = vc.u32 %v559_v26, %v555_v20  ;;  %v534_v21 = vsel %vm530_vm1, %v1095_v0, %v533_v22  ;;  %v576_v45 = vshrl.u32 %v572_v28, 16 }
  0x86   :  { %v562_v23 = vsel %vm561_vm9, 1, %v752_v54  ;;  %vm583_vm10 = vc.u32 %v581_v43, %v577_v25  ;;  %v556_v3 = vshrl.u32 %v551_v62, 16  ;;  %v578_v16 = vshrl.u32 %v573_v47, 16 }
  0x87   :  { %v462_v44 = vmul.f32 %v461_v46, %v459_v32  ;;  %v564_v34 = vadd.s32 %v562_v23, %v560_v48  ;;  %v584_v12 = vsel %vm583_vm10, 1, %v752_v54  ;;  %v466_v58 = vsel %vm343_vm5, %v465_v17, %v1078_v38 }
  0x88   :  { %v586_v50 = vadd.s32 %v584_v12, %v582_v30  ;;  %v585_v0 = vadd.s32 %v581_v43, %v577_v25  ;;  %v535_v4 = vsel %vm529_vm3, %v532_v63, %v534_v21  ;;  %v468_v9 = vsel %vm1139_vm6, 0, %v466_v58 }
  0x89   :  { %v463_v7 = vxor.u32 2147483648, %v462_v44  ;;  %v565_v29 = vadd.s32 %v564_v34, %v554_v39  ;;  %v589_v38 = vmul.u32 %v1104_v24, %v535_v4  ;;  %v485_v60 = vadd.s32 3, %v468_v9 }
  0x8a   :  { %v587_v41 = vadd.s32 %v586_v50, %v576_v45  ;;  %vm484_vm0 = vweird.f32 %v771_v5  ;;  %vm498_vm2 = vcmp.lt.s32.totalorder %v992_v55, 0  ;;  %vm497_vm3 = vcmp.le.f32.partialorder %v496_v59, 0.7853982 }
  0x8b   :  { %v464_v8 = vsel %vm343_vm5, %v463_v7, %v462_v44  ;;  %v566_v27 = vadd.s32 %v565_v29, %v556_v3  ;;  %v486_v11 = vand.u32 3, %v485_v60  ;;  %vm639_vm7 = vweird.f32 %v992_v55 }
  0x8c   :  { %v467_v36 = vsel %vm1139_vm6, %v771_v5, %v464_v8  ;;  %v588_v56 = vadd.s32 %v587_v41, %v578_v16 }
  0x8d   :  { %v469_v54 = vmul.f32 %v467_v36, %v467_v36  ;;  %vm591_vm11 = vc.u32 %v566_v27, %v585_v0  ;;  %vm491_vm12 = vcmp.eq.s32.totalorder %v486_v11, 2  ;;  %vm487_vm13 = vcmp.lt.s32.totalorder %v486_v11, 2 }
  0x8e   :  { %v592_v53 = vadd.s32 1, %v588_v56  ;;  %vm488_vm14 = vcmp.eq.s32.totalorder %v486_v11, 0  ;;  %v590_v31 = vadd.s32 %v585_v0, %v566_v27 }
  0x8f   :  { %v470_v6 = vmul.f32 -0.001358992, %v469_v54  ;;  %v477_v57 = vmul.f32 -0.00019511016, %v469_v54 }
  0x90   :  { %v593_v1 = vsel %vm591_vm11, %v592_v53, %v588_v56 }
  0x91   :  { %v471_v18 = vadd.f32 0.041655596, %v470_v6  ;;  %v478_v51 = vadd.f32 0.008332121, %v477_v57  ;;  %v594_v62 = vadd.s32 %v593_v1, %v589_v38 }
  0x93   :  { %v472_v52 = vmul.f32 %v471_v18, %v469_v54  ;;  %v479_v61 = vmul.f32 %v478_v51, %v469_v54  ;;  %v595_v47 = vadd.s32 536870912, %v594_v62 }
  0x95   :  { %v473_v2 = vadd.f32 -0.4999988, %v472_v52  ;;  %v480_v28 = vadd.f32 -0.16666654, %v479_v61  ;;  %v596_v15 = vshrl.u32 %v595_v47, 30 }
  0x97   :  { %v474_v42 = vmul.f32 %v473_v2, %v469_v54  ;;  %v481_v14 = vmul.f32 %v480_v28, %v469_v54  ;;  %v597_v13 = vshll.u32 %v596_v15, 30  ;;  %v620_v3 = vsub.s32 4, %v596_v15 }
  0x99   :  { %v475_v19 = vadd.f32 1.0, %v474_v42  ;;  %v482_v10 = vadd.f32 1.0, %v481_v14  ;;  %v598_v33 = vsub.s32 %v594_v62, %v597_v13  ;;  %v621_v16 = vsel %vm498_vm2, %v620_v3, %v596_v15 }
  0x9a   :  { %v623_v58 = vsel %vm497_vm3, 0, %v621_v16 }
  0x9b   :  { %v483_v24 = vmul.f32 %v482_v10, %v467_v36  ;;  %v492_v49 = vxor.u32 2147483648, %v475_v19  ;;  %vm599_vm15 = vcmp.lt.s32.totalorder %v598_v33, 0  ;;  %v600_v37 = vsub.s32 0, %v598_v33 }
  0x9c   :  { %v640_v41 = vadd.s32 3, %v623_v58 }
  0x9d   :  { %v489_v35 = vxor.u32 2147483648, %v483_v24  ;;  %v493_v46 = vsel %vm491_vm12, %v492_v49, %v483_v24  ;;  %v601_v17 = vsel %vm599_vm15, %v600_v37, %v598_v33 }
  0x9e   :  { %v602_v25 = vclz %v601_v17  ;;  %v641_v6 = vand.u32 3, %v640_v41 }
  0x9f   :  { %v490_v20 = vsel %vm488_vm14, %v475_v19, %v489_v35 }
  0xa0   :  { %v494_v22 = vsel %vm487_vm13, %v490_v20, %v493_v46  ;;  %v682_v26 = vadd.s32 4294967294, %v602_v25  ;;  %vm646_vm4 = vcmp.eq.s32.totalorder %v641_v6, 2  ;;  %vm643_vm5 = vcmp.eq.s32.totalorder %v641_v6, 0 }
  0xa1   :  { %v495_v32 = vsel %vm484_vm0, nan, %v494_v22  ;;  %vm642_vm6 = vcmp.lt.s32.totalorder %v641_v6, 2 }
  0xa2   :  { %653 = vst [vmem:[#allocation5 + $0x10] sm:$0xff] %v495_v32  ;;  %vm683_vm1 = vcmp.lt.s32.totalorder %v682_v26, 0 }
  0xa3   :  { %v605_v63 = vsel %vm683_vm1, 0, %v682_v26 }
  0xa4   :  { %v606_v40 = vsub.s32 32, %v605_v63  ;;  %v607_v43 = vshll.u32 %v598_v33, %v605_v63  ;;  %v610_v30 = vsub.s32 4294967266, %v605_v63 }
  0xa6   :  { %v608_v44 = vshrl.u32 %v590_v31, %v606_v40  ;;  %v611_v39 = vadd.s32 127, %v610_v30 }
  0xa8   :  { %v609_v48 = vor.u32 %v608_v44, %v607_v43  ;;  %v612_v21 = vshll.u32 %v611_v39, 23 }
  0xaa   :  { %v613_v23 = vor.u32 4788187, %v612_v21  ;;  %v616_v45 = vcvt.s32.f32 %v609_v48 }
  0xac   :  { %v614_v5 = vand.u32 2147483647, %v613_v23 }
  0xae   :  { %v617_v7 = vmul.f32 %v616_v45, %v614_v5 }
  0xb0   :  { %v618_v34 = vxor.u32 2147483648, %v617_v7 }
  0xb2   :  { %v619_v12 = vsel %vm498_vm2, %v618_v34, %v617_v7 }
  0xb3   :  { %v622_v50 = vsel %vm497_vm3, %v992_v55, %v619_v12 }
  0xb4   :  { %v624_v8 = vmul.f32 %v622_v50, %v622_v50 }
  0xb6   :  { %v625_v29 = vmul.f32 -0.001358992, %v624_v8  ;;  %v632_v0 = vmul.f32 -0.00019511016, %v624_v8 }
  0xb8   :  { %v626_v36 = vadd.f32 0.041655596, %v625_v29  ;;  %v633_v4 = vadd.f32 0.008332121, %v632_v0 }
  0xba   :  { %v627_v54 = vmul.f32 %v626_v36, %v624_v8  ;;  %v634_v27 = vmul.f32 %v633_v4, %v624_v8 }
  0xbc   :  { %v628_v9 = vadd.f32 -0.4999988, %v627_v54  ;;  %v635_v56 = vadd.f32 -0.16666654, %v634_v27 }
  0xbe   :  { %v629_v57 = vmul.f32 %v628_v9, %v624_v8  ;;  %v636_v38 = vmul.f32 %v635_v56, %v624_v8 }
  0xc0   :  { %v630_v59 = vadd.f32 1.0, %v629_v57  ;;  %v637_v53 = vadd.f32 1.0, %v636_v38 }
  0xc2   :  { %v638_v18 = vmul.f32 %v637_v53, %v622_v50  ;;  %v647_v51 = vxor.u32 2147483648, %v630_v59 }
  0xc4   :  { %v644_v60 = vxor.u32 2147483648, %v638_v18  ;;  %v648_v1 = vsel %vm646_vm4, %v647_v51, %v638_v18 }
  0xc6   :  { %v645_v52 = vsel %vm643_vm5, %v630_v59, %v644_v60 }
  0xc7   :  { %v649_v61 = vsel %vm642_vm6, %v645_v52, %v648_v1 }
  0xc8   :  { %v650_v62 = vsel %vm639_vm7, nan, %v649_v61 }
  0xc9   :  { %654 = vst [vmem:[#allocation5 + $0x18] sm:$0xff] %v650_v62 }
  0xca   :  { %665 = dma.vmem_to_hbm [thread:$0]  %s661_s11, 512, %s663_s14, [#allocation4]  }
  0xcb   :  { %743 = dma.done.wait [#allocation4], 512  }
  0xcc   :  { %744 = vsyncadd [#allocation4], 4294966784 }
  0xcd   :  { %670 = vsyncpa [#allocation3], 1 }
  0xce   :  { %671 = vsyncpa [#allocation4], 1 }

</bundles_post_ra>
